<compile_context>
chip_gen: v7x
topology: tpu7x:2x2x1
jax: 0.10.0
libtpu: 0.0.40
codegen_flags: <defaults>
</compile_context>

<pallas_src>
import functools

import jax
import jax.numpy as jnp
import numpy as np
from jax.experimental import pallas as pl
from jax.experimental.pallas import tpu as pltpu


def _round_up(a, b):
    return (a + b - 1) // b * b


def _one_conv_kernel(x_ref, h_ref, w_ref, b_ref, o_ref, col_ref, sem,
                     *, W, TH, Cin, Cin_p, G, K):
    """One (batch, row-block) grid step.

    x_ref  : (1, Cin, TH*W)        this tile's rows, flattened spatial (lanes)
    h_ref  : (1, 1, Cin, 2*pad*W)  halo rows [above ; below] (zeros at edges)
    w_ref  : (G_p, K*K*Cin_p)      weights, rows ordered (kh, kw, c), zero-padded
    b_ref  : (G_p, 1)              bias (f32), zero-padded
    o_ref  : (1, Cin+G, TH*W)      output tile = [x ; relu(conv(x))]
    col_ref: (K*K*Cin_p, TH*W)     im2col scratch (compute dtype)
    sem    : DMA semaphore for the x passthrough copy
    """
    pad = K // 2
    THW = TH * W
    halo_w = pad * W
    ext = (TH + 2 * pad) * W
    ext_p = _round_up(ext, 128)          # lane-align the rolled buffer

    # torch.cat passthrough: x -> out[:, :Cin] as a local async DMA so it hides
    # under the im2col build and the MXU matmul (frees the vector store slot).
    cp = pltpu.make_async_copy(x_ref.at[0], o_ref.at[0, :Cin, :], sem)
    cp.start()

    xm = x_ref[0]                        # (Cin, TH*W)
    halo = h_ref[0, 0]                   # (Cin, 2*pad*W)
    ha = halo[:, :halo_w]                # rows above this tile (zero at top edge)
    hb = halo[:, halo_w:]                # rows below this tile (zero at bottom)

    # Extended row buffer: [halo_above ; tile rows ; halo_below ; lane pad].
    parts = [ha, xm, hb]
    if ext_p > ext:
        parts.append(jnp.zeros((Cin, ext_p - ext), xm.dtype))
    x_ext = jnp.concatenate(parts, axis=1)            # (Cin, ext_p)
    if Cin_p > Cin:                                   # sublane-align channels
        x_ext = jnp.concatenate(
            [x_ext, jnp.zeros((Cin_p - Cin, ext_p), x_ext.dtype)], axis=0)

    # Column-validity masks.  Row validity is already encoded by the zero halos
    # (which are exactly the 'same' zero padding), so only columns need masking.
    lane = jax.lax.broadcasted_iota(jnp.int32, (1, THW), 1)
    col = lane % W
    col_ok = {dw: ((col + dw) >= 0) & ((col + dw) < W)
              for dw in range(-pad, pad + 1)}

    # Build im2col: row tap*Cin_p + c holds x[c, h + kh - pad, w + kw - pad]
    # (zero outside the image).  The spatial shift is a static XLU lane rotation
    # of the extended buffer; every wrapped/out-of-image lane is column-masked
    # or reads the zero halo/pad lanes.
    for kh in range(K):
        for kw in range(K):
            dh, dw = kh - pad, kw - pad
            off = (pad + dh) * W + dw
            shift = (-off) % ext_p
            shifted = x_ext if shift == 0 else pltpu.roll(x_ext, shift=shift,
                                                          axis=1)
            val = shifted[:, :THW]
            if dw != 0:
                val = jnp.where(col_ok[dw], val, 0)
            tap = kh * K + kw
            col_ref[tap * Cin_p:(tap + 1) * Cin_p, :] = val.astype(col_ref.dtype)

    # Single fused MXU matmul: (G_p, K*K*Cin_p) x (K*K*Cin_p, TH*W) -> (G_p, TH*W)
    prec = (jax.lax.Precision.HIGHEST
            if col_ref.dtype == jnp.float32 else None)
    acc = jnp.dot(w_ref[...], col_ref[...],
                  preferred_element_type=jnp.float32, precision=prec)
    conv = jnp.maximum(acc + b_ref[...], 0.0)          # bias add kept in f32

    o_ref[0, Cin:, :] = conv[:G].astype(o_ref.dtype)
    cp.wait()


def _pick_tile_rows(H, W, N, Cin, Cin_p, G, K, io_bytes, cmp_bytes, budget):
    """Largest divisor of H whose blocks fit the VMEM budget and keep TH*W
    lane-aligned; prefers >= 2 grid steps so both v7x TensorCores get work."""
    pad = K // 2

    def vmem_est(th):
        col = K * K * Cin_p * th * W * cmp_bytes                    # im2col scratch
        io = 2 * (2 * Cin + G + 2 * pad * Cin) * th * W * io_bytes  # 2x-buffered blocks
        tmp = 6 * Cin_p * _round_up((th + 2 * pad) * W, 128) * 4    # rolled temporaries
        return col + io + tmp

    divisors = [d for d in range(1, H + 1) if H % d == 0]
    valid = [d for d in divisors if d == H or (d * W) % 128 == 0]
    pref = [d for d in valid if N * (H // d) >= 2] or valid
    fit = [d for d in pref if vmem_est(d) <= budget]
    return max(fit) if fit else min(valid)


def one_conv_forward(x_nchw, weight, bias, *, kernel_size=3,
                     compute_dtype=jnp.bfloat16, tile_rows=None,
                     vmem_limit_bytes=48 * 1024 * 1024):
    """RDN one_conv forward: cat([x, relu(conv_same(x))], dim=1).

    x_nchw: (N, Cin, H, W); weight: (G, Cin, K, K) (PyTorch OIHW); bias: (G,).
    """
    N, Cin, H, W = x_nchw.shape
    G = weight.shape[0]
    K = kernel_size
    assert K % 2 == 1, "padding = K >> 1 only matches 'same' for odd K (stride 1)"
    assert weight.shape == (G, Cin, K, K)
    pad = K // 2

    Cin_p = _round_up(Cin, 8)
    G_p = _round_up(G, 8)
    KKC_p = K * K * Cin_p

    io_bytes = np.dtype(x_nchw.dtype).itemsize
    cmp_bytes = np.dtype(compute_dtype).itemsize
    if tile_rows is None:
        tile_rows = _pick_tile_rows(H, W, N, Cin, Cin_p, G, K, io_bytes,
                                    cmp_bytes, vmem_limit_bytes // 2)
    TH = tile_rows
    assert H % TH == 0, "tile_rows must divide H"
    assert TH == H or (TH * W) % 128 == 0, "tile must be lane-aligned or whole image"
    nT = H // TH
    THW = TH * W

    # --- host-side packing (tiny, one-off) -----------------------------------
    x_flat = x_nchw.reshape(N, Cin, H * W)            # free: NCHW is contiguous

    # Per-tile halo rows [pad above ; pad below]; zeros at the image edges
    # (this IS the 'same' zero padding, so the kernel needs no row masks).
    zrow = jnp.zeros((N, Cin, pad, W), x_nchw.dtype)
    tiles = []
    for t in range(nT):
        above = zrow if t == 0 else x_nchw[:, :, t * TH - pad:t * TH, :]
        below = (zrow if t == nT - 1
                 else x_nchw[:, :, (t + 1) * TH:(t + 1) * TH + pad, :])
        tiles.append(jnp.concatenate([above, below], axis=2))
    halo = jnp.stack(tiles, axis=1).reshape(N, nT, Cin, 2 * pad * W)

    # Weights -> (G_p, K*K*Cin_p), rows ordered (kh, kw, c); padded rows are 0.
    w_perm = jnp.transpose(weight, (0, 2, 3, 1))       # (G, K, K, Cin)
    w_perm = jnp.pad(w_perm, ((0, G_p - G), (0, 0), (0, 0), (0, Cin_p - Cin)))
    w_mat = w_perm.reshape(G_p, KKC_p).astype(compute_dtype)
    b2 = jnp.pad(bias, (0, G_p - G)).reshape(G_p, 1).astype(jnp.float32)

    kernel = functools.partial(_one_conv_kernel, W=W, TH=TH, Cin=Cin,
                               Cin_p=Cin_p, G=G, K=K)

    out_flat = pl.pallas_call(
        kernel,
        out_shape=jax.ShapeDtypeStruct((N, Cin + G, H * W), x_nchw.dtype),
        grid_spec=pltpu.PrefetchScalarGridSpec(
            num_scalar_prefetch=0,
            grid=(N, nT),
            in_specs=[
                pl.BlockSpec((1, Cin, THW), lambda n, t: (n, 0, t)),
                pl.BlockSpec((1, 1, Cin, 2 * pad * W), lambda n, t: (n, t, 0, 0)),
                pl.BlockSpec((G_p, KKC_p), lambda n, t: (0, 0)),
                pl.BlockSpec((G_p, 1), lambda n, t: (0, 0)),
            ],
            out_specs=pl.BlockSpec((1, Cin + G, THW), lambda n, t: (n, 0, t)),
            scratch_shapes=[
                pltpu.VMEM((KKC_p, THW), compute_dtype),
                pltpu.SemaphoreType.DMA(()),
            ],
        ),
        compiler_params=pltpu.CompilerParams(
            dimension_semantics=("parallel", "parallel"),
            vmem_limit_bytes=vmem_limit_bytes),
    )(x_flat, halo, w_mat, b2)

    # (N, Cin+G, H*W) -> (N, Cin+G, H, W): contiguous reshape, already NCHW.
    return out_flat.reshape(N, Cin + G, H, W)


def _reference(x_nchw, weight, bias):
    """Pure-JAX reference (lax conv) for verification."""
    y = jax.lax.conv_general_dilated(
        x_nchw, weight, window_strides=(1, 1), padding="SAME",
        dimension_numbers=("NCHW", "OIHW", "NCHW"),
        precision=jax.lax.Precision.HIGHEST)
    y = jax.nn.relu(y + bias[None, :, None, None])
    return jnp.concatenate([x_nchw, y], axis=1)


if __name__ == "__main__":
    key = jax.random.PRNGKey(0)
    k_x, k_w, k_b = jax.random.split(key, 3)

    N, Cin, H, W = 2, 4, 16, 16
    G, K = 8, 3

    x = jax.random.normal(k_x, (N, Cin, H, W), dtype=jnp.float32)
    # deterministic synthetic parameters (Conv2d(Cin, G, 3, padding=1))
    fan_in = Cin * K * K
    bound = 1.0 / np.sqrt(fan_in)
    weight = jax.random.uniform(k_w, (G, Cin, K, K), jnp.float32, -bound, bound)
    bias = jax.random.uniform(k_b, (G,), jnp.float32, -bound, bound)

    ref = jax.block_until_ready(_reference(x, weight, bias))

    # 1) f32 compute path, explicit 8-row tiles (exercises the halo/tiling path).
    out_f32 = jax.block_until_ready(
        one_conv_forward(x, weight, bias, kernel_size=K,
                         compute_dtype=jnp.float32, tile_rows=8))
    if not np.allclose(np.asarray(out_f32), np.asarray(ref), atol=1e-3, rtol=1e-3):
        raise AssertionError("Pallas kernel (f32, tiled) mismatch vs reference")

    # 2) default bf16 im2col/weights, auto tile selection (f32 accumulation).
    out_bf16 = jax.block_until_ready(
        one_conv_forward(x, weight, bias, kernel_size=K))
    if not np.allclose(np.asarray(out_bf16), np.asarray(ref), atol=3e-2, rtol=3e-2):
        raise AssertionError("Pallas kernel (bf16) mismatch vs reference")

    print("KERNEL_OK")
</pallas_src>

<mosaic_0001>
module attributes {stable_mosaic.version = 11 : i64} {
  func.func @_one_conv_kernel(%arg0: i32, %arg1: i32, %arg2: memref<1x4x128xf32, #tpu.memory_space<vmem>>, %arg3: memref<1x1x4x32xf32, #tpu.memory_space<vmem>>, %arg4: memref<8x72xf32, #tpu.memory_space<vmem>>, %arg5: memref<8x1xf32, #tpu.memory_space<vmem>>, %arg6: memref<1x12x128xf32, #tpu.memory_space<vmem>>, %arg7: memref<72x128xf32, #tpu.memory_space<vmem>>, %arg8: memref<!tpu.dma_semaphore, #tpu.memory_space<semaphore_mem>>) attributes {dimension_semantics = [#tpu.dimension_semantics<parallel>, #tpu.dimension_semantics<parallel>], iteration_bounds = array<i64: 2, 2>, scalar_prefetch = 0 : i64, scratch_operands = 2 : i64, tpu.core_type = #tpu.core_type<tc>, window_params = [{transform_indices = @transform_0, window_bounds = array<i64: 1, 4, 128>}, {transform_indices = @transform_1, window_bounds = array<i64: 1, 1, 4, 32>}, {pipeline_mode = #tpu.pipeline_mode<synchronous>, transform_indices = @transform_2, window_bounds = array<i64: 8, 72>}, {pipeline_mode = #tpu.pipeline_mode<synchronous>, transform_indices = @transform_3, window_bounds = array<i64: 8, 1>}, {transform_indices = @transform_4, window_bounds = array<i64: 1, 12, 128>}]} {
    %c0_i32 = arith.constant 0 : i32
    %c0_i32_0 = arith.constant 0 : i32
    %c0_i32_1 = arith.constant 0 : i32
    %c0_i32_2 = arith.constant 0 : i32
    %0 = tpu.memref_slice %arg2[%c0_i32, %c0_i32_1, %c0_i32_2] : memref<1x4x128xf32, #tpu.memory_space<vmem>> -> memref<1x4x128xf32, #tpu.memory_space<vmem>>
    %1 = tpu.memref_squeeze %0 : memref<1x4x128xf32, #tpu.memory_space<vmem>> -> memref<4x128xf32, #tpu.memory_space<vmem>>
    %c0_i32_3 = arith.constant 0 : i32
    %c0_i32_4 = arith.constant 0 : i32
    %2 = tpu.memref_slice %arg6[%c0_i32_0, %c0_i32_3, %c0_i32_4] : memref<1x12x128xf32, #tpu.memory_space<vmem>> -> memref<1x4x128xf32, #tpu.memory_space<vmem>>
    %3 = tpu.memref_squeeze %2 : memref<1x4x128xf32, #tpu.memory_space<vmem>> -> memref<4x128xf32, #tpu.memory_space<vmem>>
    tpu.enqueue_dma source(%1 : memref<4x128xf32, #tpu.memory_space<vmem>>) target(%3 : memref<4x128xf32, #tpu.memory_space<vmem>>) target_semaphore(%arg8 : memref<!tpu.dma_semaphore, #tpu.memory_space<semaphore_mem>>)
    %c0 = arith.constant 0 : index
    %c0_5 = arith.constant 0 : index
    %c0_6 = arith.constant 0 : index
    %4 = vector.load %arg2[%c0, %c0_5, %c0_6] : memref<1x4x128xf32, #tpu.memory_space<vmem>>, vector<1x4x128xf32>
    %5 = vector.shape_cast %4 : vector<1x4x128xf32> to vector<4x128xf32>
    %c0_7 = arith.constant 0 : index
    %c0_8 = arith.constant 0 : index
    %c0_9 = arith.constant 0 : index
    %c0_10 = arith.constant 0 : index
    %6 = vector.load %arg3[%c0_7, %c0_8, %c0_9, %c0_10] : memref<1x1x4x32xf32, #tpu.memory_space<vmem>>, vector<1x1x4x32xf32>
    %7 = vector.shape_cast %6 : vector<1x1x4x32xf32> to vector<4x32xf32>
    %8 = vector.extract_strided_slice %7 {offsets = [0, 0], sizes = [4, 16], strides = [1, 1]} : vector<4x32xf32> to vector<4x16xf32>
    %9 = vector.extract_strided_slice %7 {offsets = [0, 16], sizes = [4, 16], strides = [1, 1]} : vector<4x32xf32> to vector<4x16xf32>
    %cst = arith.constant 0.000000e+00 : f32
    %10 = vector.broadcast %cst : f32 to vector<4x96xf32>
    %11 = tpu.concatenate %8, %5, %9, %10 in 1 : vector<4x16xf32>, vector<4x128xf32>, vector<4x16xf32>, vector<4x96xf32> -> vector<4x256xf32>
    %cst_11 = arith.constant 0.000000e+00 : f32
    %12 = vector.broadcast %cst_11 : f32 to vector<4x256xf32>
    %13 = tpu.concatenate %11, %12 in 0 : vector<4x256xf32>, vector<4x256xf32> -> vector<8x256xf32>
    %14 = tpu.iota {dimensions = array<i32: 1>} : vector<1x128xi32>
    %c16_i32 = arith.constant 16 : i32
    %c0_i32_12 = arith.constant 0 : i32
    %15 = arith.cmpi eq, %c16_i32, %c0_i32_12 : i32
    %c1_i32 = arith.constant 1 : i32
    %16 = arith.select %15, %c1_i32, %c16_i32 : i32
    %17 = vector.broadcast %16 : i32 to vector<1x128xi32>
    %18 = arith.remsi %14, %17 : vector<1x128xi32>
    %c0_i32_13 = arith.constant 0 : i32
    %19 = vector.broadcast %c0_i32_13 : i32 to vector<1x128xi32>
    %20 = arith.cmpi ne, %18, %19 : vector<1x128xi32>
    %c0_i32_14 = arith.constant 0 : i32
    %21 = vector.broadcast %c0_i32_14 : i32 to vector<1x128xi32>
    %22 = arith.cmpi slt, %18, %21 : vector<1x128xi32>
    %c0_i32_15 = arith.constant 0 : i32
    %23 = arith.cmpi slt, %16, %c0_i32_15 : i32
    %24 = vector.broadcast %23 : i1 to vector<1x128xi1>
    %25 = vector.broadcast %24 : vector<1x128xi1> to vector<1x128xi1>
    %26 = arith.xori %22, %25 : vector<1x128xi1>
    %27 = arith.andi %26, %20 : vector<1x128xi1>
    %28 = vector.broadcast %16 : i32 to vector<1x128xi32>
    %29 = arith.addi %18, %28 : vector<1x128xi32>
    %30 = arith.select %27, %29, %18 : vector<1x128xi1>, vector<1x128xi32>
    %c-1_i32 = arith.constant -1 : i32
    %31 = vector.broadcast %c-1_i32 : i32 to vector<1x128xi32>
    %32 = arith.addi %30, %31 : vector<1x128xi32>
    %c0_i32_16 = arith.constant 0 : i32
    %33 = vector.broadcast %c0_i32_16 : i32 to vector<1x128xi32>
    %34 = arith.cmpi sge, %32, %33 : vector<1x128xi32>
    %c-1_i32_17 = arith.constant -1 : i32
    %35 = vector.broadcast %c-1_i32_17 : i32 to vector<1x128xi32>
    %36 = arith.addi %30, %35 : vector<1x128xi32>
    %c16_i32_18 = arith.constant 16 : i32
    %37 = vector.broadcast %c16_i32_18 : i32 to vector<1x128xi32>
    %38 = arith.cmpi slt, %36, %37 : vector<1x128xi32>
    %39 = arith.andi %34, %38 : vector<1x128xi1>
    %c1_i32_19 = arith.constant 1 : i32
    %40 = vector.broadcast %c1_i32_19 : i32 to vector<1x128xi32>
    %41 = arith.addi %30, %40 : vector<1x128xi32>
    %c0_i32_20 = arith.constant 0 : i32
    %42 = vector.broadcast %c0_i32_20 : i32 to vector<1x128xi32>
    %43 = arith.cmpi sge, %41, %42 : vector<1x128xi32>
    %c1_i32_21 = arith.constant 1 : i32
    %44 = vector.broadcast %c1_i32_21 : i32 to vector<1x128xi32>
    %45 = arith.addi %30, %44 : vector<1x128xi32>
    %c16_i32_22 = arith.constant 16 : i32
    %46 = vector.broadcast %c16_i32_22 : i32 to vector<1x128xi32>
    %47 = arith.cmpi slt, %45, %46 : vector<1x128xi32>
    %48 = arith.andi %43, %47 : vector<1x128xi1>
    %c1_i32_23 = arith.constant 1 : i32
    %49 = tpu.dynamic_rotate %13 by %c1_i32_23 dim 1 : vector<8x256xf32>, i32 -> vector<8x256xf32>
    %50 = vector.extract_strided_slice %49 {offsets = [0, 0], sizes = [8, 128], strides = [1, 1]} : vector<8x256xf32> to vector<8x128xf32>
    %c0_i32_24 = arith.constant 0 : i32
    %51 = arith.sitofp %c0_i32_24 : i32 to f32
    %52 = vector.shape_cast %39 : vector<1x128xi1> to vector<1x128xi1>
    %53 = vector.broadcast %52 : vector<1x128xi1> to vector<8x128xi1>
    %54 = vector.broadcast %51 : f32 to vector<8x128xf32>
    %55 = arith.select %53, %50, %54 : vector<8x128xi1>, vector<8x128xf32>
    %c0_25 = arith.constant 0 : index
    %c0_26 = arith.constant 0 : index
    %56 = vector.load %arg7[%c0_25, %c0_26] : memref<72x128xf32, #tpu.memory_space<vmem>>, vector<8x128xf32>
    tpu.vector_store %arg7[%c0_25, %c0_26], %55 {strides = array<i32>} : memref<72x128xf32, #tpu.memory_space<vmem>>, vector<8x128xf32>,
    %57 = vector.extract_strided_slice %13 {offsets = [0, 0], sizes = [8, 128], strides = [1, 1]} : vector<8x256xf32> to vector<8x128xf32>
    %c8 = arith.constant 8 : index
    %c0_27 = arith.constant 0 : index
    %58 = vector.load %arg7[%c8, %c0_27] : memref<72x128xf32, #tpu.memory_space<vmem>>, vector<8x128xf32>
    tpu.vector_store %arg7[%c8, %c0_27], %57 {strides = array<i32>} : memref<72x128xf32, #tpu.memory_space<vmem>>, vector<8x128xf32>,
    %c255_i32 = arith.constant 255 : i32
    %59 = tpu.dynamic_rotate %13 by %c255_i32 dim 1 : vector<8x256xf32>, i32 -> vector<8x256xf32>
    %60 = vector.extract_strided_slice %59 {offsets = [0, 0], sizes = [8, 128], strides = [1, 1]} : vector<8x256xf32> to vector<8x128xf32>
    %c0_i32_28 = arith.constant 0 : i32
    %61 = arith.sitofp %c0_i32_28 : i32 to f32
    %62 = vector.shape_cast %48 : vector<1x128xi1> to vector<1x128xi1>
    %63 = vector.broadcast %62 : vector<1x128xi1> to vector<8x128xi1>
    %64 = vector.broadcast %61 : f32 to vector<8x128xf32>
    %65 = arith.select %63, %60, %64 : vector<8x128xi1>, vector<8x128xf32>
    %c16 = arith.constant 16 : index
    %c0_29 = arith.constant 0 : index
    %66 = vector.load %arg7[%c16, %c0_29] : memref<72x128xf32, #tpu.memory_space<vmem>>, vector<8x128xf32>
    tpu.vector_store %arg7[%c16, %c0_29], %65 {strides = array<i32>} : memref<72x128xf32, #tpu.memory_space<vmem>>, vector<8x128xf32>,
    %c241_i32 = arith.constant 241 : i32
    %67 = tpu.dynamic_rotate %13 by %c241_i32 dim 1 : vector<8x256xf32>, i32 -> vector<8x256xf32>
    %68 = vector.extract_strided_slice %67 {offsets = [0, 0], sizes = [8, 128], strides = [1, 1]} : vector<8x256xf32> to vector<8x128xf32>
    %c0_i32_30 = arith.constant 0 : i32
    %69 = arith.sitofp %c0_i32_30 : i32 to f32
    %70 = vector.shape_cast %39 : vector<1x128xi1> to vector<1x128xi1>
    %71 = vector.broadcast %70 : vector<1x128xi1> to vector<8x128xi1>
    %72 = vector.broadcast %69 : f32 to vector<8x128xf32>
    %73 = arith.select %71, %68, %72 : vector<8x128xi1>, vector<8x128xf32>
    %c24 = arith.constant 24 : index
    %c0_31 = arith.constant 0 : index
    %74 = vector.load %arg7[%c24, %c0_31] : memref<72x128xf32, #tpu.memory_space<vmem>>, vector<8x128xf32>
    tpu.vector_store %arg7[%c24, %c0_31], %73 {strides = array<i32>} : memref<72x128xf32, #tpu.memory_space<vmem>>, vector<8x128xf32>,
    %c240_i32 = arith.constant 240 : i32
    %75 = tpu.dynamic_rotate %13 by %c240_i32 dim 1 : vector<8x256xf32>, i32 -> vector<8x256xf32>
    %76 = vector.extract_strided_slice %75 {offsets = [0, 0], sizes = [8, 128], strides = [1, 1]} : vector<8x256xf32> to vector<8x128xf32>
    %c32 = arith.constant 32 : index
    %c0_32 = arith.constant 0 : index
    %77 = vector.load %arg7[%c32, %c0_32] : memref<72x128xf32, #tpu.memory_space<vmem>>, vector<8x128xf32>
    tpu.vector_store %arg7[%c32, %c0_32], %76 {strides = array<i32>} : memref<72x128xf32, #tpu.memory_space<vmem>>, vector<8x128xf32>,
    %c239_i32 = arith.constant 239 : i32
    %78 = tpu.dynamic_rotate %13 by %c239_i32 dim 1 : vector<8x256xf32>, i32 -> vector<8x256xf32>
    %79 = vector.extract_strided_slice %78 {offsets = [0, 0], sizes = [8, 128], strides = [1, 1]} : vector<8x256xf32> to vector<8x128xf32>
    %c0_i32_33 = arith.constant 0 : i32
    %80 = arith.sitofp %c0_i32_33 : i32 to f32
    %81 = vector.shape_cast %48 : vector<1x128xi1> to vector<1x128xi1>
    %82 = vector.broadcast %81 : vector<1x128xi1> to vector<8x128xi1>
    %83 = vector.broadcast %80 : f32 to vector<8x128xf32>
    %84 = arith.select %82, %79, %83 : vector<8x128xi1>, vector<8x128xf32>
    %c40 = arith.constant 40 : index
    %c0_34 = arith.constant 0 : index
    %85 = vector.load %arg7[%c40, %c0_34] : memref<72x128xf32, #tpu.memory_space<vmem>>, vector<8x128xf32>
    tpu.vector_store %arg7[%c40, %c0_34], %84 {strides = array<i32>} : memref<72x128xf32, #tpu.memory_space<vmem>>, vector<8x128xf32>,
    %c225_i32 = arith.constant 225 : i32
    %86 = tpu.dynamic_rotate %13 by %c225_i32 dim 1 : vector<8x256xf32>, i32 -> vector<8x256xf32>
    %87 = vector.extract_strided_slice %86 {offsets = [0, 0], sizes = [8, 128], strides = [1, 1]} : vector<8x256xf32> to vector<8x128xf32>
    %c0_i32_35 = arith.constant 0 : i32
    %88 = arith.sitofp %c0_i32_35 : i32 to f32
    %89 = vector.shape_cast %39 : vector<1x128xi1> to vector<1x128xi1>
    %90 = vector.broadcast %89 : vector<1x128xi1> to vector<8x128xi1>
    %91 = vector.broadcast %88 : f32 to vector<8x128xf32>
    %92 = arith.select %90, %87, %91 : vector<8x128xi1>, vector<8x128xf32>
    %c48 = arith.constant 48 : index
    %c0_36 = arith.constant 0 : index
    %93 = vector.load %arg7[%c48, %c0_36] : memref<72x128xf32, #tpu.memory_space<vmem>>, vector<8x128xf32>
    tpu.vector_store %arg7[%c48, %c0_36], %92 {strides = array<i32>} : memref<72x128xf32, #tpu.memory_space<vmem>>, vector<8x128xf32>,
    %c224_i32 = arith.constant 224 : i32
    %94 = tpu.dynamic_rotate %13 by %c224_i32 dim 1 : vector<8x256xf32>, i32 -> vector<8x256xf32>
    %95 = vector.extract_strided_slice %94 {offsets = [0, 0], sizes = [8, 128], strides = [1, 1]} : vector<8x256xf32> to vector<8x128xf32>
    %c56 = arith.constant 56 : index
    %c0_37 = arith.constant 0 : index
    %96 = vector.load %arg7[%c56, %c0_37] : memref<72x128xf32, #tpu.memory_space<vmem>>, vector<8x128xf32>
    tpu.vector_store %arg7[%c56, %c0_37], %95 {strides = array<i32>} : memref<72x128xf32, #tpu.memory_space<vmem>>, vector<8x128xf32>,
    %c223_i32 = arith.constant 223 : i32
    %97 = tpu.dynamic_rotate %13 by %c223_i32 dim 1 : vector<8x256xf32>, i32 -> vector<8x256xf32>
    %98 = vector.extract_strided_slice %97 {offsets = [0, 0], sizes = [8, 128], strides = [1, 1]} : vector<8x256xf32> to vector<8x128xf32>
    %c0_i32_38 = arith.constant 0 : i32
    %99 = arith.sitofp %c0_i32_38 : i32 to f32
    %100 = vector.shape_cast %48 : vector<1x128xi1> to vector<1x128xi1>
    %101 = vector.broadcast %100 : vector<1x128xi1> to vector<8x128xi1>
    %102 = vector.broadcast %99 : f32 to vector<8x128xf32>
    %103 = arith.select %101, %98, %102 : vector<8x128xi1>, vector<8x128xf32>
    %c64 = arith.constant 64 : index
    %c0_39 = arith.constant 0 : index
    %104 = vector.load %arg7[%c64, %c0_39] : memref<72x128xf32, #tpu.memory_space<vmem>>, vector<8x128xf32>
    tpu.vector_store %arg7[%c64, %c0_39], %103 {strides = array<i32>} : memref<72x128xf32, #tpu.memory_space<vmem>>, vector<8x128xf32>,
    %c0_40 = arith.constant 0 : index
    %c0_41 = arith.constant 0 : index
    %105 = vector.load %arg4[%c0_40, %c0_41] : memref<8x72xf32, #tpu.memory_space<vmem>>, vector<8x72xf32>
    %c0_42 = arith.constant 0 : index
    %c0_43 = arith.constant 0 : index
    %106 = vector.load %arg7[%c0_42, %c0_43] : memref<72x128xf32, #tpu.memory_space<vmem>>, vector<72x128xf32>
    %cst_44 = arith.constant dense<0.000000e+00> : vector<8x128xf32>
    %107 = tpu.matmul %105, %106, %cst_44 {dimension_numbers = #tpu.dot_dimension_numbers<[1], [0], [0], [1], [0, 0, 1, 1], [], []>, precision = #tpu.contract_precision<fp32>} : vector<8x72xf32>, vector<72x128xf32>, vector<8x128xf32> -> vector<8x128xf32>
    %c0_45 = arith.constant 0 : index
    %c0_46 = arith.constant 0 : index
    %108 = vector.load %arg5[%c0_45, %c0_46] : memref<8x1xf32, #tpu.memory_space<vmem>>, vector<8x1xf32>
    %109 = vector.broadcast %108 : vector<8x1xf32> to vector<8x128xf32>
    %110 = arith.addf %107, %109 : vector<8x128xf32>
    %cst_47 = arith.constant 0.000000e+00 : f32
    %111 = vector.broadcast %cst_47 : f32 to vector<8x128xf32>
    %112 = arith.maximumf %110, %111 : vector<8x128xf32>
    %c0_48 = arith.constant 0 : index
    %c4 = arith.constant 4 : index
    %c0_49 = arith.constant 0 : index
    %113 = vector.load %arg6[%c0_48, %c4, %c0_49] : memref<1x12x128xf32, #tpu.memory_space<vmem>>, vector<1x8x128xf32>
    %114 = vector.shape_cast %113 : vector<1x8x128xf32> to vector<8x128xf32>
    %115 = vector.shape_cast %112 : vector<8x128xf32> to vector<1x8x128xf32>
    tpu.vector_store %arg6[%c0_48, %c4, %c0_49], %115 {strides = array<i32>} : memref<1x12x128xf32, #tpu.memory_space<vmem>>, vector<1x8x128xf32>,
    %c0_i32_50 = arith.constant 0 : i32
    %c0_i32_51 = arith.constant 0 : i32
    %c0_i32_52 = arith.constant 0 : i32
    %c0_i32_53 = arith.constant 0 : i32
    %116 = tpu.memref_slice %arg2[%c0_i32_50, %c0_i32_52, %c0_i32_53] : memref<1x4x128xf32, #tpu.memory_space<vmem>> -> memref<1x4x128xf32, #tpu.memory_space<vmem>>
    %117 = tpu.memref_squeeze %116 : memref<1x4x128xf32, #tpu.memory_space<vmem>> -> memref<4x128xf32, #tpu.memory_space<vmem>>
    %c0_i32_54 = arith.constant 0 : i32
    %c0_i32_55 = arith.constant 0 : i32
    %118 = tpu.memref_slice %arg6[%c0_i32_51, %c0_i32_54, %c0_i32_55] : memref<1x12x128xf32, #tpu.memory_space<vmem>> -> memref<1x4x128xf32, #tpu.memory_space<vmem>>
    %119 = tpu.memref_squeeze %118 : memref<1x4x128xf32, #tpu.memory_space<vmem>> -> memref<4x128xf32, #tpu.memory_space<vmem>>
    tpu.wait_dma2 semaphore(%arg8 : memref<!tpu.dma_semaphore, #tpu.memory_space<semaphore_mem>>) src(%117 : memref<4x128xf32, #tpu.memory_space<vmem>>) dst(%119 : memref<4x128xf32, #tpu.memory_space<vmem>>)
    return
  }
  func.func @transform_0(%arg0: i32, %arg1: i32) -> (i32, i32, i32) {
    %c0_i32 = arith.constant 0 : i32
    %c0_i32_0 = arith.constant 0 : i32
    return %arg0, %c0_i32, %arg1 : i32, i32, i32
  }
  func.func @transform_1(%arg0: i32, %arg1: i32) -> (i32, i32, i32, i32) {
    %c0_i32 = arith.constant 0 : i32
    %c0_i32_0 = arith.constant 0 : i32
    %c0_i32_1 = arith.constant 0 : i32
    return %arg0, %arg1, %c0_i32, %c0_i32_0 : i32, i32, i32, i32
  }
  func.func @transform_2(%arg0: i32, %arg1: i32) -> (i32, i32) {
    %c0_i32 = arith.constant 0 : i32
    %c0_i32_0 = arith.constant 0 : i32
    %c0_i32_1 = arith.constant 0 : i32
    return %c0_i32, %c0_i32_0 : i32, i32
  }
  func.func @transform_3(%arg0: i32, %arg1: i32) -> (i32, i32) {
    %c0_i32 = arith.constant 0 : i32
    %c0_i32_0 = arith.constant 0 : i32
    %c0_i32_1 = arith.constant 0 : i32
    return %c0_i32, %c0_i32_0 : i32, i32
  }
  func.func @transform_4(%arg0: i32, %arg1: i32) -> (i32, i32, i32) {
    %c0_i32 = arith.constant 0 : i32
    %c0_i32_0 = arith.constant 0 : i32
    return %arg0, %c0_i32, %arg1 : i32, i32, i32
  }
}

</mosaic_0001>

<bundles_post_ra>
// kernel: tpu_custom_call.1
= control target key start
LH: loop header
LB: loop body
LE: loop exit
PB: predicated region body
PF: predicated region fallthrough
CT: control target
= control target key end

     0   :  { %9 = vsyncpa [#allocation5], 0  ;;  %s2084_s0 = inlined_call_operand.hbm [shape: f32[2,4,256], index: 0, kind: input, shape index: {}]   ;;  %s2085_s1 = inlined_call_operand.hbm [shape: f32[2,2,4,32], index: 1, kind: input, shape index: {}]   ;;  %s2086_s2 = inlined_call_operand.vmem [shape: f32[8,72], index: 2, kind: input, shape index: {}]   ;;  %s2087_s3 = inlined_call_operand.vmem [shape: f32[8,1], index: 3, kind: input, shape index: {}]   ;;  %s2088_s4 = inlined_call_operand.vmem [shape: f32[2,12,256], index: 4, kind: output, shape index: {}]  }
   0x1   :  { %11 = vsyncpa [#allocation5 + $0x1], 0 }
   0x2   :  { %12 = vsyncpa [#allocation7], 0 }
   0x3   :  { %14 = vsyncpa [#allocation7 + $0x1], 0  ;;  %s1708_s15 = smov 0   ;;  %s1710_s16 = smov 0  }
   0x4   :  { %s1712_s17 = smov 0   ;;  %s1714_s18 = smov 0  }
   0x5   :  { %s1716_s19 = smov 0   ;;  %s1718_s20 = smov 0  }
   0x6   :  { %s1720_s21 = smov 0   ;;  %s1722_s22 = smov 0  }
   0x7 LB: > { %s1155_s23 = sadd.s32 4294967295, %s1666_s22   ;;  %s29_s24 = sadd.s32 1, %s1658_s20  ;;  %s1666_s22 = sphi %s1722_s22, %s20_s22   ;;  %s1662_s21 = sphi %s1720_s21, %s2108_s21   ;;  %s1658_s20 = sphi %s1718_s20, %s2107_s20   ;;  %s1654_s19 = sphi %s1716_s19, %s2106_s19   ;;  %s1650_s18 = sphi %s1714_s18, %s2105_s18   ;;  %s1646_s17 = sphi %s1712_s17, %s2104_s17   ;;  %s1642_s16 = sphi %s1710_s16, %s2103_s16   ;;  %s1638_s15 = sphi %s1708_s15, %s2102_s15  }
   0x8   : > { %p30_p0 = scmp.ge.s32.totalorder %s29_s24, 2  ;;  %s32_s25 = sadd.s32 1, %s1662_s21 }
   0x9   : > { %s41_s26 = sadd.s32 1, %s1646_s17  ;;  %p48_p1 = scmp.ne.s32.totalorder %s1646_s17, %s1642_s16 }
   0xa   : > { %s2110_s24 = smov (%p30_p0, %s29_s24), 0  ;;  %s2112_s25 = smov (!%p30_p0, %s32_s25), %s1662_s21 }
   0xb   : > { %s37_s27 = ssub.s32 %s1658_s20, %s2110_s24  ;;  %p49_p2 = scmp.eq.s32.totalorder %s1666_s22, 0 }
   0xc   : > { %p34_p3 = scmp.ge.s32.totalorder %s2112_s25, 2  ;;  %p54_p4 = scmp.ne.s32.totalorder %s1642_s16, %s1638_s15 }
   0xd   : > { %p1762_p5 = por %p49_p2, %p48_p1  ;;  %p55_p6 = scmp.eq.s32.totalorder %s1155_s23, 0 }
   0xe   : > { %s2114_s25 = smov (%p34_p3, %s2112_s25), 0  ;;  %p150_p8 = scmp.eq.s32.totalorder %s1155_s23, 3 }
   0xf   : > { %p1768_p7 = por %p55_p6, %p54_p4  ;;  %s36_s30 = ssub.s32 %s1662_s21, %s2114_s25 }
  0x10   : > { %s38_s5 = sor.u32 %s37_s27, %s36_s30  ;;  %p1777_p9 = por %p150_p8, %p48_p1 }
  0x11   : > { %s2092_s29 = scalar_select %p1768_p7, 1, 0 }
  0x12   : > { %s2093_s6 = scalar_select %p1777_p9, 1, 0 }
  0x13   : > { %p39_p10 = scmp.eq.s32.totalorder %s38_s5, 0  ;;  %p1454_p11 = scmp.lt.s32.totalorder %s1666_s22, 4 }
  0x14   : > { %s1783_s7 = sand.u32 1, %s1646_s17   ;;  %s1160_s8 = sshll.u32 %s1662_s21, 1 }
  0x15   : > { %s1787_s9 = scalar_select %p39_p10, %s1646_s17, %s41_s26  }
  0x16   : > { %s2089_s10 = sshll.u32 %s1783_s7, 2  ;;  %s1791_s11 = sadd.s32 %s1658_s20, %s1160_s8 }
  0x17   : > { %s1161_s12 = sshll.u32 %s1791_s11, 6  ;;  %s186_s13 = scalar_lea.vmem [#allocation4], %s2089_s10 }
  0x18   : > { %s195_s14 = sshll.u32 %s186_s13, 4  ;;  %s1801_s27 = scalar_lea.hbm %s2084_s0, %s1161_s12  ;;  %s1803_s14 = int_to_ptr.vmem [resolvable:$true] %s195_s14 }
  0x19   : > { %p1807_p12 = pnand %p1454_p11, %p1762_p5  ;;  %s183_s30 = scalar_lea.sflag [#allocation5], %s1783_s7 }
  0x1a   : > { %s1534_s5 = scalar_lea.hbm %s1801_s27, 64  ;;  %s1539_s28 = scalar_lea.hbm %s2084_s0, 256 }
  0x1b   : > { %p1535_p1 = scmp.ne.s32.totalorder %s1801_s27, %s1534_s5  ;;  %p1536_p2 = pneg %p1807_p12 }
  0x1c   : > { %p1540_p5 = scmp.lt.u32.totalorder %s1801_s27, %s2084_s0  ;;  %p1541_p6 = scmp.lt.u32.totalorder %s1539_s28, %s1534_s5 }
  0x1d   : > { %p1537_p3 = pnand %p1536_p2, %p1535_p1  ;;  %p1543_p10 = scmp.lt.u32.totalorder %s1534_s5, %s1801_s27 }
  0x1e   : > { %p1542_p8 = por %p1541_p6, %p1540_p5 }
  0x1f   : > { %p1538_p4 = pneg %p1537_p3 }
  0x20   : > { %p1544_p11 = por %p1543_p10, %p1542_p8 }
  0x22   : > { %p1545_p13 = pnand %p1544_p11, %p1538_p4 }
  0x24   : > { %1548 = shalt.err (!%p1545_p13)
}
  0x25   : > { %s1549_s10 = scalar_lea.vmem %s1803_s14, 64  ;;  %s1668_s8 = smov [#allocation4]  }
  0x26   : > { %p1550_p1 = scmp.ne.s32.totalorder %s1803_s14, %s1549_s10  ;;  %s1554_s13 = sshll.u32 %s1668_s8, 4  ;;  %s1555_s13 = int_to_ptr.vmem [resolvable:$false] %s1554_s13 }
  0x27   : > { %s1556_s15 = scalar_lea.vmem %s1555_s13, 128  ;;  %p1557_p9 = scmp.lt.s32.totalorder %s1803_s14, %s1555_s13 }
  0x28   : > { %p1552_p3 = pnand %p1550_p1, %p1536_p2  ;;  %p1558_p5 = scmp.lt.s32.totalorder %s1556_s15, %s1549_s10 }
  0x2a   : > { %p1553_p0 = pneg %p1552_p3  ;;  %p1559_p6 = por %p1558_p5, %p1557_p9 }
  0x2c   : > { %p1560_p8 = pnand %p1559_p6, %p1553_p0 }
  0x2e   : > { %1563 = shalt.err (!%p1560_p8)
}
  0x2f   : > { %1450 = dma.hbm_to_vmem [thread:$0]  (!%p1807_p12), %s1801_s27, 64, %s1803_s14, %s183_s30  }
  0x30   : > { %p2095_p13 = scmp.lt.s32.totalorder %s1666_s22, 5  ;;  %p2096_p4 = scmp.ge.s32.totalorder %s1666_s22, 1 }
  0x31   : > { %s1852_s23 = scalar_lea.hbm %s2085_s1, %s1161_s12  ;;  %s2098_s8 = sshll.u32 %s1783_s7, 2 }
  0x32   : > { %p1843_p10 = pnand %p2096_p4, %p2095_p13  ;;  %s206_s13 = scalar_lea.vmem [#allocation6], %s2098_s8 }
  0x33   : > { %s215_s15 = sshll.u32 %s206_s13, 4  ;;  %s203_s14 = scalar_lea.sflag [#allocation7], %s1783_s7  ;;  %s216_s15 = int_to_ptr.vmem [resolvable:$true] %s215_s15 }
  0x34   : > { %s2097_s5 = scalar_select %p1843_p10, 1, 0 }
  0x35   : > { %s1564_s27 = scalar_lea.hbm %s1852_s23, 64  ;;  %s1569_s12 = scalar_lea.hbm %s2085_s1, 256 }
  0x36   : > { %p1565_p9 = scmp.ne.s32.totalorder %s1852_s23, %s1564_s27  ;;  %p1570_p1 = scmp.lt.u32.totalorder %s1852_s23, %s2085_s1 }
  0x37   : > { %p1571_p3 = scmp.lt.u32.totalorder %s1569_s12, %s1564_s27  ;;  %p1573_p6 = scmp.lt.u32.totalorder %s1564_s27, %s1852_s23 }
  0x38   : > { %p1567_p0 = pnand %p1565_p9, %p1536_p2 }
  0x39   : > { %p1572_p5 = por %p1571_p3, %p1570_p1 }
  0x3a   : > { %p1568_p11 = pneg %p1567_p0 }
  0x3b   : > { %p1574_p8 = por %p1573_p6, %p1572_p5 }
  0x3d   : > { %p1575_p13 = pnand %p1574_p8, %p1568_p11 }
  0x3f   : > { %1578 = shalt.err (!%p1575_p13)
}
  0x40   : > { %s1579_s7 = scalar_lea.vmem %s216_s15, 64  ;;  %s1669_s8 = smov [#allocation6]  }
  0x41   : > { %p1580_p4 = scmp.ne.s32.totalorder %s216_s15, %s1579_s7  ;;  %s1584_s13 = sshll.u32 %s1669_s8, 4  ;;  %s1585_s13 = int_to_ptr.vmem [resolvable:$false] %s1584_s13 }
  0x42   : > { %s1586_s11 = scalar_lea.vmem %s1585_s13, 128  ;;  %p1587_p7 = scmp.lt.s32.totalorder %s216_s15, %s1585_s13 }
  0x43   : > { %p1582_p9 = pnand %p1580_p4, %p1536_p2  ;;  %p1588_p10 = scmp.lt.s32.totalorder %s1586_s11, %s1579_s7 }
  0x45   : > { %p1583_p0 = pneg %p1582_p9  ;;  %p1589_p1 = por %p1588_p10, %p1587_p7 }
  0x47   : > { %p1590_p3 = pnand %p1589_p1, %p1583_p0 }
  0x49   : > { %1593 = shalt.err (!%p1590_p3)
}
  0x4a   : > { %1453 = dma.hbm_to_vmem [thread:$0]  (!%p1807_p12), %s1852_s23, 64, %s216_s15, %s203_s14  }
  0x4b   : > { %p2099_p11 = scmp.ne.s32.totalorder %s2097_s5, 0 }
  0x4c   : > { %s226_s27 = sand.u32 (!%p2099_p11), 1, %s1642_s16   ;;  %p2100_p2 = scmp.ne.s32.totalorder (!%p2099_p11), %s2092_s29, 0 }
  0x4d   : > { %224 = sbr.rel (%p2099_p11) target bundleno = 622 (0x26e), region = 36  ;;  %s1166_s30 = sshll.u32 (!%p2099_p11), %s226_s27, 2 }
  0x4e   : > { %s227_s12 = scalar_lea.sflag (!%p2099_p11), [#allocation5], %s226_s27  ;;  %s230_s10 = scalar_lea.vmem (!%p2099_p11), [#allocation4], %s1166_s30 }
  0x54   : > { %1627 = dma.done.wait (%p2100_p2), %s227_s12, 64  }
  0x55   : > { %1629 = vsyncadd (%p2100_p2), %s227_s12, 4294967232  ;;  %s236_s28 = scalar_lea.sflag [#allocation7], %s226_s27  ;;  %s239_s7 = scalar_lea.vmem [#allocation6], %s1166_s30 }
  0x56   : > { %1631 = dma.done.wait (%p2100_p2), %s236_s28, 64  }
  0x57   : > { %1633 = vsyncadd (%p2100_p2), %s236_s28, 4294967232  ;;  %s1168_s26 = sshll.u32 %s226_s27, 4  ;;  %v285_v0 = vld [vmem:[%s230_s10] sm:$0xf]  ;;  %s1670_s23 = smov 16  }
  0x58   : > { %s1887_s5 = scalar_lea.vmem [#allocation8], %s1168_s26  ;;  %v312_v1 = vld [vmem:[%s230_s10] sm:$0xf] }
  0x59   : > { %286 = vst [vmem:[%s1887_s5] sm:$0xf] %v285_v0  ;;  %315 = vrot.lane.b32.xlu0 %v312_v1, %s1670_s23 }
  0x5a   : > { %311 = vsyncadd [#allocation3], 64  ;;  %v313_v2 = vld [vmem:[%s239_s7] sm:$0xf]  ;;  %vm318_vm0 = vcmask 130048   ;;  %vm323_vm1 = vcmask 1043456   ;;  %v326_v13 = vlaneseq }
  0x5b   : > { %vm321_vm2 = vcmask 261120   ;;  %s1671_s29 = smov 127   ;;  %s1672_s15 = smov 1   ;;  %v1673_v8 = vmov 0.0|0.0   ;;  %vm1678_vm3 = vmmov 0   ;;  %v1679_v10 = vmov 0.0  }
  0x5c   : > { %1361 = vmatprep.subr.bf16.mxu1 %v1673_v8  ;;  %1397 = vmatprep.subr.bf16.mxu0 %v1673_v8  ;;  %s1674_s14 = smov 113   ;;  %s1675_s8 = smov 111   ;;  %v425_v11 = vld [vmem:[%s2087_s3] sm:$0xff]  ;;  %v1682_v12 = vmov 0   ;;  %v1909_v14 = vand.u32 127, %v326_v13  ;;  %vm431_vm10 = vcmask 588800  }
  0x5d   : > { %s1676_s13 = smov 112   ;;  %s1677_s11 = smov 97   ;;  %1253 = vmatprep.mubr.msk.f32.mxu1 %vm1678_vm3, %v1679_v10  ;;  %1316 = vmatprep.mubr.msk.f32.mxu0 %vm1678_vm3, %v1679_v10  ;;  %v415_v28 = vld [vmem:[%s2086_s2] sm:$0xff] }
  0x5e   : > { %s1680_s27 = smov 96   ;;  %s1681_s30 = smov 95   ;;  %1532 = vset.pattern.permute.xlu1 %v1682_v12  ;;  %1533 = vset.pattern.permute.xlu0 %v1682_v12  ;;  %v332_v17 = vand.u32 15, %v1909_v14  ;;  %vm352_vm4 = vcmp.lt.s32.totalorder %v1909_v14, 1  ;;  %vm373_vm5 = vcmp.lt.s32.totalorder %v1909_v14, 113  ;;  %vm363_vm6 = vcmp.lt.s32.totalorder %v1909_v14, 127 }
  0x5f   : > { %vm388_vm9 = vcmp.lt.s32.totalorder %v1909_v14, 111  ;;  %v433_v36 = vsel %vm431_vm10, %v415_v28, 0  ;;  %vm381_vm11 = vcmp.lt.s32.totalorder %v1909_v14, 112  ;;  %vm396_vm12 = vcmp.lt.s32.totalorder %v1909_v14, 97 }
  0x60   : > { %v340_v18 = vadd.s32 4294967295, %v332_v17  ;;  %v1912_v21 = vadd.s32 1, %v332_v17  ;;  %v1934_v43 = vand.u32 4294901760, %v433_v36  ;;  %vm404_vm13 = vcmp.lt.s32.totalorder %v1909_v14, 96 }
  0x61   : > { %vm411_vm14 = vcmp.lt.s32.totalorder %v1909_v14, 95 }
  0x62   : > { %vm341_vm7 = vcmp.ge.s32.totalorder %v340_v18, 0  ;;  %vm346_vm8 = vcmp.lt.s32.totalorder %v1912_v21, 16  ;;  %v1948_v52 = vsub.f32 %v433_v36, %v1934_v43 }
  0x64   : > { %v511_v60 = vand.u32 4294901760, %v1948_v52 }
  0xcb   : > { %v316_v3 = vpop.permute.xlu0 %315 }
  0xcc   : > { %v319_v4 = vsel %vm318_vm0, %v313_v2, %v316_v3  ;;  %v320_v5 = vsel %vm318_vm0, %v316_v3, %v313_v2 }
  0xcd   : > { %v1890_v6 = vsel %vm323_vm1, %v319_v4, 0.0  ;;  %v322_v7 = vsel %vm321_vm2, %v320_v5, 0.0 }
  0xce   : > { %359 = vrot.lane.b32.xlu1 %v1890_v6, %s1671_s29  ;;  %348 = vrot.lane.b32.xlu0 %v1890_v6, %s1672_s15  ;;  %v325_v9 = vsel %vm323_vm1, %v322_v7, 0.0  ;;  %v439_v33 = vand.u32 4294901760, %v1890_v6 }
  0xd0   : > { %v1951_v53 = vsub.f32 %v1890_v6, %v439_v33 }
  0xd2   : > { %369 = vrot.lane.b32.xlu1 %v1890_v6, %s1674_s14  ;;  %361 = vrot.lane.b32.xlu0 %v325_v9, %s1671_s29  ;;  %v529_v63 = vand.u32 4294901760, %v1951_v53 }
  0xd6   : > { %350 = vrot.lane.b32.xlu1 %v325_v9, %s1672_s15  ;;  %371 = vrot.lane.b32.xlu0 %v325_v9, %s1674_s14 }
  0xda   : > { %384 = vrot.lane.b32.xlu1 %v1890_v6, %s1675_s8  ;;  %386 = vrot.lane.b32.xlu0 %v325_v9, %s1675_s8 }
  0xde   : > { %377 = vrot.lane.b32.xlu1 %v1890_v6, %s1676_s13  ;;  %379 = vrot.lane.b32.xlu0 %v325_v9, %s1676_s13 }
  0xe2   : > { %392 = vrot.lane.b32.xlu1 %v1890_v6, %s1677_s11  ;;  %394 = vrot.lane.b32.xlu0 %v325_v9, %s1677_s11 }
  0xe6   : > { %400 = vrot.lane.b32.xlu1 %v1890_v6, %s1680_s27  ;;  %402 = vrot.lane.b32.xlu0 %v325_v9, %s1680_s27 }
  0xea   : > { %407 = vrot.lane.b32.xlu1 %v1890_v6, %s1681_s30  ;;  %409 = vrot.lane.b32.xlu0 %v325_v9, %s1681_s30  ;;  %v512_v9 = vsub.f32 %v1948_v52, %v511_v60 }
  0xee   : > { %428 = vperm.xlu1 %1532, %v425_v11  }
 0x140   : > { %v360_v15 = vpop.permute.xlu1 %359  ;;  %v349_v16 = vpop.permute.xlu0 %348 }
 0x144   : > { %v370_v19 = vpop.permute.xlu1 %369  ;;  %v362_v20 = vpop.permute.xlu0 %361 }
 0x145   : > { %v364_v26 = vsel %vm363_vm6, %v360_v15, %v362_v20  ;;  %v530_v15 = vsub.f32 %v1951_v53, %v529_v63 }
 0x146   : > { %v367_v34 = vsel %vm346_vm8, %v364_v26, 0.0 }
 0x147   : > { %v442_v40 = vand.u32 4294901760, %v367_v34 }
 0x148   : > { %v351_v22 = vpop.permute.xlu1 %350  ;;  %v372_v23 = vpop.permute.xlu0 %371 }
 0x149   : > { %v353_v24 = vsel %vm352_vm4, %v351_v22, %v349_v16  ;;  %v374_v25 = vsel %vm373_vm5, %v370_v19, %v372_v23  ;;  %v1963_v61 = vsub.f32 %v367_v34, %v442_v40  ;;  %v513_v22 = vand.u32 4294901760, %v512_v9 }
 0x14a   : > { %v356_v27 = vsel %vm341_vm7, %v353_v24, 0.0  ;;  %v375_v30 = vsel %vm341_vm7, %v374_v25, 0.0  ;;  %v531_v25 = vand.u32 4294901760, %v530_v15 }
 0x14b   : > { %v436_v29 = vand.u32 4294901760, %v356_v27  ;;  %v445_v37 = vand.u32 4294901760, %v375_v30  ;;  %v536_v11 = vand.u32 4294901760, %v1963_v61 }
 0x14c   : > { %v385_v31 = vpop.permute.xlu1 %384  ;;  %v387_v32 = vpop.permute.xlu0 %386 }
 0x14d   : > { %v389_v35 = vsel %vm388_vm9, %v385_v31, %v387_v32  ;;  %v1927_v38 = vpack.c.bf16 %v439_v33, %v436_v29  ;;  %v1938_v47 = vpack.c.bf16 %v445_v37, %v442_v40  ;;  %v1941_v48 = vsub.f32 %v356_v27, %v436_v29 }
 0x14e   : > { %v390_v39 = vsel %vm346_vm8, %v389_v35, 0.0  ;;  %v1955_v55 = vsub.f32 %v375_v30, %v445_v37  ;;  %v537_v23 = vsub.f32 %v1963_v61, %v536_v11 }
 0x14f   : > { %1363 = vmatpush3.bf16.msra.mxu1 %v1927_v38  ;;  %1399 = vmatpush3.bf16.msra.mxu0 %v1927_v38  ;;  %v451_v45 = vand.u32 4294901760, %v390_v39  ;;  %v522_v56 = vand.u32 4294901760, %v1941_v48 }
 0x150   : > { %v378_v41 = vpop.permute.xlu1 %377  ;;  %v380_v42 = vpop.permute.xlu0 %379  ;;  %1364 = vmatprep.subr.bf16.mxu1 %v1673_v8  ;;  %1400 = vmatprep.subr.bf16.mxu0 %v1673_v8  ;;  %v543_v0 = vand.u32 4294901760, %v1955_v55  ;;  %v538_v31 = vand.u32 4294901760, %v537_v23 }
 0x151   : > { %v382_v44 = vsel %vm381_vm11, %v378_v41, %v380_v42  ;;  %v523_v3 = vsub.f32 %v1941_v48, %v522_v56  ;;  %v1977_v12 = vsub.f32 %v390_v39, %v451_v45  ;;  %v1410_v26 = vpack.c.bf16 %v529_v63, %v522_v56 }
 0x152   : > { %v448_v46 = vand.u32 4294901760, %v382_v44  ;;  %v544_v16 = vsub.f32 %v1955_v55, %v543_v0  ;;  %v1413_v34 = vpack.c.bf16 %v543_v0, %v536_v11 }
 0x153   : > { %1366 = vmatpush3.bf16.msra.mxu1 %v1938_v47  ;;  %1402 = vmatpush3.bf16.msra.mxu0 %v1938_v47  ;;  %v524_v17 = vand.u32 4294901760, %v523_v3  ;;  %v557_v21 = vand.u32 4294901760, %v1977_v12 }
 0x154   : > { %v393_v49 = vpop.permute.xlu1 %392  ;;  %v395_v50 = vpop.permute.xlu0 %394  ;;  %v1945_v51 = vpack.c.bf16 %v451_v45, %v448_v46  ;;  %1367 = vmatprep.subr.bf16.mxu1 %v1673_v8  ;;  %1403 = vmatprep.subr.bf16.mxu0 %v1673_v8  ;;  %v1971_v4 = vsub.f32 %v382_v44, %v448_v46  ;;  %v545_v27 = vand.u32 4294901760, %v544_v16 }
 0x155   : > { %v397_v54 = vsel %vm396_vm12, %v393_v49, %v395_v50  ;;  %v1374_v30 = vpack.c.bf16 %v531_v25, %v524_v17  ;;  %v558_v32 = vsub.f32 %v1977_v12, %v557_v21 }
 0x156   : > { %v398_v57 = vsel %vm341_vm7, %v397_v54, 0.0  ;;  %v550_v18 = vand.u32 4294901760, %v1971_v4  ;;  %v1377_v39 = vpack.c.bf16 %v545_v27, %v538_v31 }
 0x157   : > { %1369 = vmatpush3.bf16.msra.mxu1 %v1945_v51  ;;  %1405 = vmatpush3.bf16.msra.mxu0 %v1945_v51  ;;  %v454_v1 = vand.u32 4294901760, %v398_v57  ;;  %v559_v40 = vand.u32 4294901760, %v558_v32 }
 0x158   : > { %v401_v58 = vpop.permute.xlu1 %400  ;;  %v403_v59 = vpop.permute.xlu0 %402  ;;  %1370 = vmatprep.subr.bf16.mxu1 %v1673_v8  ;;  %1406 = vmatprep.subr.bf16.mxu0 %v1673_v8  ;;  %v551_v28 = vsub.f32 %v1971_v4, %v550_v18  ;;  %v1416_v46 = vpack.c.bf16 %v557_v21, %v550_v18 }
 0x159   : > { %v405_v62 = vsel %vm404_vm13, %v401_v58, %v403_v59  ;;  %v1994_v24 = vsub.f32 %v398_v57, %v454_v1  ;;  %v1386_v58 = vpack.c.bf16 %v1951_v53, %v1941_v48  ;;  %v1389_v59 = vpack.c.bf16 %v1955_v55, %v1963_v61 }
 0x15a   : > { %v457_v2 = vand.u32 4294901760, %v405_v62  ;;  %v552_v35 = vand.u32 4294901760, %v551_v28 }
 0x15b   : > { %v564_v33 = vand.u32 4294901760, %v1994_v24 }
 0x15c   : > { %v408_v5 = vpop.permute.xlu1 %407  ;;  %v410_v6 = vpop.permute.xlu0 %409  ;;  %v1973_v7 = vpack.c.bf16 %v457_v2, %v454_v1  ;;  %v1986_v19 = vsub.f32 %v405_v62, %v457_v2  ;;  %v1380_v45 = vpack.c.bf16 %v559_v40, %v552_v35 }
 0x15d   : > { %v412_v13 = vsel %vm411_vm14, %v408_v5, %v410_v6  ;;  %v565_v41 = vsub.f32 %v1994_v24, %v564_v33 }
 0x15e   : > { %v413_v14 = vsel %vm346_vm8, %v412_v13, 0.0  ;;  %1372 = vmatpush3.bf16.msra.mxu1 %v1973_v7  ;;  %1408 = vmatpush3.bf16.msra.mxu0 %v1973_v7  ;;  %v571_v29 = vand.u32 4294901760, %v1986_v19  ;;  %v1395_v48 = vpack.c.bf16 %v1986_v19, %v1994_v24 }
 0x15f   : > { %v1988_v20 = vand.u32 4294901760, %v413_v14  ;;  %1251 = vmatprep.subr.mxu1 %v1679_v10  ;;  %1314 = vmatprep.subr.mxu0 %v1679_v10  ;;  %v566_v49 = vand.u32 4294901760, %v565_v41 }
 0x160   : > { %v572_v36 = vsub.f32 %v1986_v19, %v571_v29  ;;  %v1419_v54 = vpack.c.bf16 %v571_v29, %v564_v33 }
 0x161   : > { %v577_v37 = vsub.f32 %v413_v14, %v1988_v20 }
 0x162   : > { %1252 = vmatpush3.msra.mxu1 %v1988_v20  ;;  %1315 = vmatpush3.msra.mxu0 %v1988_v20  ;;  %v573_v42 = vand.u32 4294901760, %v572_v36 }
 0x163   : > { %1373 = vmatprep.subr.bf16.mxu1 %v1673_v8  ;;  %1409 = vmatprep.subr.bf16.mxu0 %v1673_v8  ;;  %v578_v44 = vand.u32 4294901760, %v577_v37 }
 0x164   : > { %1254 = vmatmul.mubr.f32.vlgmr.msra.gmra.mrb[0].mxu1 %v513_v22  ;;  %1317 = vmatmul.mubr.f32.vlgmr.msra.gmra.mrb[0].mxu0 %v511_v60  ;;  %v1383_v50 = vpack.c.bf16 %v573_v42, %v566_v49 }
 0x165   : > { %1375 = vmatpush3.bf16.msra.mxu1 %v1374_v30  ;;  %1411 = vmatpush3.bf16.msra.mxu0 %v1410_v26  ;;  %v579_v56 = vsub.f32 %v577_v37, %v578_v44 }
 0x166   : > { %1376 = vmatprep.subr.bf16.mxu1 %v1673_v8  ;;  %1412 = vmatprep.subr.bf16.mxu0 %v1673_v8 }
 0x167   : > { %1274 = vmatprep.mubr.msk.f32.mxu1 %vm1678_vm3, %v1679_v10  ;;  %1337 = vmatprep.mubr.msk.f32.mxu0 %vm1678_vm3, %v1679_v10  ;;  %v580_v57 = vand.u32 4294901760, %v579_v56 }
 0x169   : > { %1378 = vmatpush3.bf16.msra.mxu1 %v1377_v39  ;;  %1414 = vmatpush3.bf16.msra.mxu0 %v1413_v34 }
 0x16a   : > { %1379 = vmatprep.subr.bf16.mxu1 %v1673_v8  ;;  %1415 = vmatprep.subr.bf16.mxu0 %v1673_v8 }
 0x16d   : > { %1381 = vmatpush3.bf16.msra.mxu1 %v1380_v45  ;;  %1417 = vmatpush3.bf16.msra.mxu0 %v1416_v46 }
 0x16e   : > { %1382 = vmatprep.subr.bf16.mxu1 %v1673_v8  ;;  %1418 = vmatprep.subr.bf16.mxu0 %v1673_v8 }
 0x171   : > { %1384 = vmatpush3.bf16.msra.mxu1 %v1383_v50  ;;  %1420 = vmatpush3.bf16.msra.mxu0 %v1419_v54 }
 0x172   : > { %1272 = vmatprep.subr.mxu1 %v1679_v10  ;;  %1335 = vmatprep.subr.mxu0 %v1679_v10 }
 0x175   : > { %1273 = vmatpush3.msra.mxu1 %v580_v57  ;;  %1336 = vmatpush3.msra.mxu0 %v578_v44 }
 0x176   : > { %1385 = vmatprep.subr.bf16.mxu1 %v1673_v8  ;;  %1421 = vmatprep.subr.bf16.mxu0 %v1673_v8 }
 0x177   : > { %1275 = vmatmul.mubr.f32.vlgmr.msra.gmra.mrb[0].mxu1 %v1934_v43  ;;  %1338 = vmatmul.mubr.f32.vlgmr.msra.gmra.mrb[0].mxu0 %v1934_v43 }
 0x178   : > { %1387 = vmatpush3.bf16.msra.mxu1 %v1386_v58  ;;  %1423 = vmatpush3.bf16.msra.mxu0 %v1927_v38  ;;  %v1392_v38 = vpack.c.bf16 %v1977_v12, %v1971_v4 }
 0x179   : > { %1388 = vmatprep.subr.bf16.mxu1 %v1673_v8  ;;  %1424 = vmatprep.subr.bf16.mxu0 %v1673_v8 }
 0x17a   : > { %1295 = vmatprep.mubr.msk.f32.mxu1 %vm1678_vm3, %v1679_v10  ;;  %1358 = vmatprep.mubr.msk.f32.mxu0 %vm1678_vm3, %v1679_v10 }
 0x17c   : > { %1390 = vmatpush3.bf16.msra.mxu1 %v1389_v59  ;;  %1426 = vmatpush3.bf16.msra.mxu0 %v1938_v47  ;;  %v429_v47 = vpop.permute.xlu1 %428 }
 0x17d   : > { %1391 = vmatprep.subr.bf16.mxu1 %v1673_v8  ;;  %1427 = vmatprep.subr.bf16.mxu0 %v1673_v8 }
 0x180   : > { %1393 = vmatpush3.bf16.msra.mxu1 %v1392_v38  ;;  %1429 = vmatpush3.bf16.msra.mxu0 %v1945_v51 }
 0x181   : > { %1394 = vmatprep.subr.bf16.mxu1 %v1673_v8  ;;  %1430 = vmatprep.subr.bf16.mxu0 %v1673_v8 }
 0x184   : > { %1396 = vmatpush3.bf16.msra.mxu1 %v1395_v48  ;;  %1432 = vmatpush3.bf16.msra.mxu0 %v1973_v7 }
 0x185   : > { %1293 = vmatprep.subr.mxu1 %v1679_v10  ;;  %1356 = vmatprep.subr.mxu0 %v1679_v10 }
 0x188   : > { %1294 = vmatpush3.msra.mxu1 %v577_v37  ;;  %1357 = vmatpush3.msra.mxu0 %v1988_v20 }
 0x189   : > { %1296 = vmatmul.mubr.f32.vlgmr.msra.gmra.mrb[0].mxu1 %v1948_v52  ;;  %1359 = vmatmul.mubr.f32.vlgmr.msra.gmra.mrb[0].mxu0 %v1934_v43 }
 0x25c   : > { %v721_v8 = vpop.f32.mrb[0].mxu1  ;;  %v981_v51 = vpop.f32.mrb[0].mxu0 }
 0x25d   : > { %v1433_v53 = vadd.f32 %v721_v8, %v429_v47  ;;  %v1297_v55 = vpop.f32.mrb[1].mxu1  ;;  %v1360_v60 = vpop.f32.mrb[1].mxu0 }
 0x25f   : > { %v1434_v61 = vadd.f32 %v1433_v53, %v981_v51 }
 0x261   : > { %v985_v62 = vmax.f32 %v1434_v61, 0.0 }
 0x263   : > { %986 = vst [vmem:[%s1887_s5 + $0x4] sm:$0xff] %v985_v62 }
 0x264   : > { %1634 = dma.done.wait [#allocation3], 64 }
 0x265   : > { %1635 = vsyncadd [#allocation3], 4294967232  ;;  %p2101_p7 = scmp.ne.s32.totalorder %s2093_s6, 0 }
 0x266   : > { %s1170_s26 = sshll.u32 (%p2101_p7), %s1654_s19, 2 }
 0x267   : > { %996 = sbr.rel (!%p2101_p7) target bundleno = 622 (0x26e), region = 78  ;;  %s998_s23 = sadd.s32 (%p2101_p7), %s1650_s18, %s1170_s26 }
 0x268   : > { %s1171_s29 = sshll.u32 (%p2101_p7), %s998_s23, 3 }
 0x269   : > { %s1000_s8 = scalar_lea.vmem (%p2101_p7), %s2088_s4, %s1171_s29 }
 0x26a   : > { %v1030_v10 = vld [vmem:[%s1887_s5] sm:$0xff] (%p2101_p7)  ;;  %v1032_v43 = vld [vmem:[%s1887_s5 + $0x8] sm:$0xff] (%p2101_p7) }
 0x26b   : > { %1031 = vst [vmem:[%s1000_s8] sm:$0xff] (%p2101_p7), %v1030_v10  ;;  %1033 = vst [vmem:[%s1000_s8 + $0x10] sm:$0xff] (%p2101_p7), %v1032_v43 }
 0x26e PF: > { %s20_s22 = sadd.s32 1, %s1666_s22   ;;  %s2102_s15 = smov %s1642_s16 }
 0x26f   : > { %p17_p12 = scmp.ge.s32.totalorder %s20_s22, 6   ;;  %s2103_s16 = smov %s1646_s17 }
 0x270   : > { %s2104_s17 = smov %s1787_s9  ;;  %s2105_s18 = smov %s1658_s20 }
 0x271   : > { %s2106_s19 = smov %s1662_s21  ;;  %s2107_s20 = smov %s2110_s24 }
 0x272   : > { %s2108_s21 = smov %s2114_s25  ;;  %19 = sbr.rel (!%p17_p12) target bundleno = 7 (0x7), region = 167 }
 0x279   :  { %1049 = vsyncpa [#allocation5], 1 }
 0x27a   :  { %1051 = vsyncpa [#allocation5 + $0x1], 1 }
 0x27b   :  { %1052 = vsyncpa [#allocation7], 1 }
 0x27c   :  { %1054 = vsyncpa [#allocation7 + $0x1], 1 }
 0x27d   :  { %1055 = vsyncmov [#allocation3] }
 0x280   :  { %s1056_s6 = vpop.sfrf %1055 }
 0x281   :  { %p1174_p10 = scmp.ne.s32.totalorder %s1056_s6, 0 }
 0x283   :  { %1060 = shalt.err (%p1174_p10)  }

</bundles_post_ra>
